<compile_context>
chip_gen: v7x
topology: tpu7x:2x2x1
jax: 0.10.0
libtpu: 0.0.40
codegen_flags: <defaults>
</compile_context>

<pallas_src>
import functools

import jax
import jax.numpy as jnp
from jax.experimental import pallas as pl
from jax.experimental.pallas import tpu as pltpu

_EPS = 1e-5
_NEG_SLOPE = 0.01


def _round_up(n, m):
    return (n + m - 1) // m * m


def _pad_to(a, shape, value=0.0):
    pads = [(0, s - d) for d, s in zip(a.shape, shape)]
    if all(p == (0, 0) for p in pads):
        return a
    return jnp.pad(a, pads, constant_values=value)


def _leaky(x):
    return jnp.where(x >= 0, x, _NEG_SLOPE * x)


def _bn_scale_shift(sum_, sumsq, gamma, beta, inv_b):
    """Fused training-mode BatchNorm1d: per-feature (scale, shift) vectors."""
    mean = sum_ * inv_b
    var = jnp.maximum(sumsq * inv_b - mean * mean, 0.0)   # biased variance
    scale = gamma * jax.lax.rsqrt(var + _EPS)
    shift = beta - mean * scale
    return scale, shift


def _bn_apply(h, gamma, beta, inv_b, mask):
    """One-pass BN over axis 0 of h (f32). `mask` zeroes batch-padding rows."""
    hm = h if mask is None else jnp.where(mask, h, 0.0)
    s = jnp.sum(hm, axis=0, keepdims=True)
    q = jnp.sum(hm * hm, axis=0, keepdims=True)
    scale, shift = _bn_scale_shift(s, q, gamma, beta, inv_b)
    return h * scale + shift


# ----------------------------------------------------------------------------
# Single-block kernel (grid=()): whole (padded) batch resident in VMEM.
# ----------------------------------------------------------------------------
def _single_block_kernel(x_ref, w1_ref, g1_ref, be1_ref,
                         w2_ref, g2_ref, be2_ref, w3_ref, b3_ref, o_ref,
                         *, b_true, b_pad):
    inv_b = 1.0 / b_true
    if b_pad != b_true:
        rows = jax.lax.broadcasted_iota(jnp.int32, (b_pad, 1), 0)
        mask = rows < b_true
    else:
        mask = None

    # Layer 1: Linear (bias omitted: cancelled exactly by BN) -> BN -> leaky.
    h1 = jnp.dot(x_ref[...], w1_ref[...], preferred_element_type=jnp.float32)
    a1 = _leaky(_bn_apply(h1, g1_ref[...], be1_ref[...], inv_b, mask))

    # Layer 2: Linear (bias omitted) -> BN -> leaky.
    h2 = jnp.dot(a1.astype(jnp.bfloat16), w2_ref[...],
                 preferred_element_type=jnp.float32)
    a2 = _leaky(_bn_apply(h2, g2_ref[...], be2_ref[...], inv_b, mask))

    # Layer 3: Linear -> tanh.
    h3 = jnp.dot(a2.astype(jnp.bfloat16), w3_ref[...],
                 preferred_element_type=jnp.float32) + b3_ref[...]
    o_ref[...] = jnp.tanh(h3).astype(o_ref.dtype)


# ----------------------------------------------------------------------------
# Batch-tiled kernel: grid = (3 phases, batch tiles), both axes "arbitrary".
#   phase 0: accumulate layer-1 full-batch sum / sumsq in VMEM scratch
#   phase 1: accumulate layer-2 full-batch sum / sumsq
#   phase 2: full forward per batch tile, write the output tile
# Weights stay VMEM-resident (block index never changes); only x / out tiles
# stream, so VMEM is bounded by the batch tile, not by B.
# ----------------------------------------------------------------------------
def _tiled_kernel(x_ref, w1_ref, g1_ref, be1_ref, w2_ref, g2_ref, be2_ref,
                  w3_ref, b3_ref, o_ref,
                  s1_ref, q1_ref, s2_ref, q2_ref,
                  *, b_true, tb, need_mask):
    p = pl.program_id(0)   # phase
    t = pl.program_id(1)   # batch tile
    inv_b = 1.0 / b_true

    if need_mask:
        rows = jax.lax.broadcasted_iota(jnp.int32, (tb, 1), 0) + t * tb
        mask = rows < b_true
    else:
        mask = None

    def _masked(h):
        return h if mask is None else jnp.where(mask, h, 0.0)

    # Layer-1 pre-activation for this tile (needed in every phase).
    h1 = jnp.dot(x_ref[...], w1_ref[...], preferred_element_type=jnp.float32)

    # ---- phase 0: layer-1 full-batch statistics ----
    @pl.when((p == 0) & (t == 0))
    def _():
        s1_ref[...] = jnp.zeros_like(s1_ref)
        q1_ref[...] = jnp.zeros_like(q1_ref)

    @pl.when(p == 0)
    def _():
        hm = _masked(h1)
        s1_ref[...] += jnp.sum(hm, axis=0, keepdims=True)
        q1_ref[...] += jnp.sum(hm * hm, axis=0, keepdims=True)

    # ---- phase 1: layer-2 full-batch statistics ----
    @pl.when((p == 1) & (t == 0))
    def _():
        s2_ref[...] = jnp.zeros_like(s2_ref)
        q2_ref[...] = jnp.zeros_like(q2_ref)

    @pl.when(p == 1)
    def _():
        sc1, sh1 = _bn_scale_shift(s1_ref[...], q1_ref[...],
                                   g1_ref[...], be1_ref[...], inv_b)
        a1 = _leaky(h1 * sc1 + sh1)
        h2 = jnp.dot(a1.astype(jnp.bfloat16), w2_ref[...],
                     preferred_element_type=jnp.float32)
        hm = _masked(h2)
        s2_ref[...] += jnp.sum(hm, axis=0, keepdims=True)
        q2_ref[...] += jnp.sum(hm * hm, axis=0, keepdims=True)

    # ---- phase 2: final forward for this tile ----
    @pl.when(p == 2)
    def _():
        sc1, sh1 = _bn_scale_shift(s1_ref[...], q1_ref[...],
                                   g1_ref[...], be1_ref[...], inv_b)
        a1 = _leaky(h1 * sc1 + sh1)
        h2 = jnp.dot(a1.astype(jnp.bfloat16), w2_ref[...],
                     preferred_element_type=jnp.float32)
        sc2, sh2 = _bn_scale_shift(s2_ref[...], q2_ref[...],
                                   g2_ref[...], be2_ref[...], inv_b)
        a2 = _leaky(h2 * sc2 + sh2)
        h3 = jnp.dot(a2.astype(jnp.bfloat16), w3_ref[...],
                     preferred_element_type=jnp.float32) + b3_ref[...]
        o_ref[...] = jnp.tanh(h3).astype(o_ref.dtype)


# ----------------------------------------------------------------------------
# Wrapper
# ----------------------------------------------------------------------------
def generator_forward(x, params, *, batch_tile=None):
    """Forward pass of the WGAN Generator.

    x: [B, input_size] float32.
    params: dict from init_params (weights stored as [in_features, out_features]).
    batch_tile: if given and < B, use the batch-tiled 3-phase kernel
      (pipelined DMA, bounded VMEM).  BN always uses full-batch statistics.
    """
    B, in_size = x.shape
    hidden = params["w1"].shape[1]
    out_size = params["w3"].shape[1]

    hp = _round_up(hidden, 128)     # lane-dense feature dims
    op = _round_up(out_size, 128)

    # Zero-pad feature dims; matmul operands as bf16 (f32 accumulation in-kernel).
    w1 = _pad_to(params["w1"], (in_size, hp)).astype(jnp.bfloat16)
    w2 = _pad_to(params["w2"], (hp, hp)).astype(jnp.bfloat16)
    w3 = _pad_to(params["w3"], (hp, op)).astype(jnp.bfloat16)
    g1 = _pad_to(params["g1"], (1, hp), value=1.0)
    be1 = _pad_to(params["be1"], (1, hp))
    g2 = _pad_to(params["g2"], (1, hp), value=1.0)
    be2 = _pad_to(params["be2"], (1, hp))
    b3 = _pad_to(params["b3"], (1, op))
    # NOTE: params["b1"] / params["b2"] are deliberately unused — a bias added
    # right before BatchNorm is cancelled exactly when BN subtracts the mean.

    use_tiled = batch_tile is not None and batch_tile < B
    if use_tiled:
        tb = _round_up(min(batch_tile, B), 16)   # bf16 sublane-aligned tile
        bp = _round_up(B, tb)
        nbt = bp // tb
        if nbt <= 1:
            use_tiled = False
    if not use_tiled:
        tb = bp = _round_up(B, 8)
        nbt = 1

    x_p = _pad_to(x, (bp, in_size)).astype(jnp.bfloat16)
    weight_args = (w1, g1, be1, w2, g2, be2, w3, b3)
    vmem_limit = 32 * 1024 * 1024

    if not use_tiled:
        kernel = functools.partial(_single_block_kernel, b_true=B, b_pad=bp)
        full = lambda a: pl.BlockSpec(a.shape, lambda *_: (0,) * a.ndim)
        out = pl.pallas_call(
            kernel,
            out_shape=jax.ShapeDtypeStruct((bp, op), jnp.float32),
            grid=(),
            in_specs=[full(x_p)] + [full(a) for a in weight_args],
            out_specs=pl.BlockSpec((bp, op), lambda *_: (0, 0)),
            compiler_params=pltpu.CompilerParams(vmem_limit_bytes=vmem_limit),
        )(x_p, *weight_args)
    else:
        kernel = functools.partial(_tiled_kernel, b_true=B, tb=tb,
                                   need_mask=(bp != B))
        resident = lambda a: pl.BlockSpec(a.shape, lambda p, t: (0,) * a.ndim)
        out = pl.pallas_call(
            kernel,
            out_shape=jax.ShapeDtypeStruct((bp, op), jnp.float32),
            grid=(3, nbt),   # (phase, batch tile); phase is the outer axis
            in_specs=[pl.BlockSpec((tb, in_size), lambda p, t: (t, 0))]
                     + [resident(a) for a in weight_args],
            out_specs=pl.BlockSpec((tb, op), lambda p, t: (t, 0)),
            scratch_shapes=[pltpu.VMEM((1, hp), jnp.float32)] * 4,
            compiler_params=pltpu.CompilerParams(
                dimension_semantics=("arbitrary", "arbitrary"),
                vmem_limit_bytes=vmem_limit),
        )(x_p, *weight_args)

    return out[:B, :out_size]


def init_params(key, input_size, hidden_size, output_size):
    """Mirrors nn.Linear default init (uniform +-1/sqrt(fan_in)) and
    BatchNorm1d defaults (gamma=1, beta=0).  Weights stored as [in, out]."""
    ks = jax.random.split(key, 6)

    def linear(kw, kb, fan_in, fan_out):
        bound = 1.0 / float(fan_in) ** 0.5
        w = jax.random.uniform(kw, (fan_in, fan_out), jnp.float32, -bound, bound)
        b = jax.random.uniform(kb, (1, fan_out), jnp.float32, -bound, bound)
        return w, b

    w1, b1 = linear(ks[0], ks[1], input_size, hidden_size)
    w2, b2 = linear(ks[2], ks[3], hidden_size, hidden_size)
    w3, b3 = linear(ks[4], ks[5], hidden_size, output_size)

    return dict(
        w1=w1, b1=b1,
        g1=jnp.ones((1, hidden_size), jnp.float32),
        be1=jnp.zeros((1, hidden_size), jnp.float32),
        w2=w2, b2=b2,
        g2=jnp.ones((1, hidden_size), jnp.float32),
        be2=jnp.zeros((1, hidden_size), jnp.float32),
        w3=w3, b3=b3,
    )


def reference_forward(x, p):
    """Pure-JAX reference with the exact module semantics: biases included,
    two-pass BN variance, gamma/beta applied BEFORE leaky_relu (fixes the bug
    flagged in review).  Matmul inputs are cast to bf16 to mirror the kernel's
    deliberate precision choice (everything else in f32)."""
    def dot(a, w):
        return jnp.dot(a.astype(jnp.bfloat16), w.astype(jnp.bfloat16),
                       preferred_element_type=jnp.float32)

    def bn(h, gamma, beta):
        m = jnp.mean(h, axis=0, keepdims=True)
        v = jnp.mean((h - m) ** 2, axis=0, keepdims=True)
        return (h - m) * jax.lax.rsqrt(v + _EPS) * gamma + beta

    h = dot(x, p["w1"]) + p["b1"]
    h = _leaky(bn(h, p["g1"], p["be1"]))
    h = dot(h, p["w2"]) + p["b2"]
    h = _leaky(bn(h, p["g2"], p["be2"]))
    return jnp.tanh(dot(h, p["w3"]) + p["b3"])


if __name__ == "__main__":
    input_size, hidden_size, output_size = 8, 32, 16

    key = jax.random.PRNGKey(0)
    kx1, kx2, kp, kg1, kb1, kg2, kb2 = jax.random.split(key, 7)

    params = init_params(kp, input_size, hidden_size, output_size)
    # Non-default BN affine params so the correctness check exercises gamma/beta.
    params["g1"] = jax.random.uniform(kg1, (1, hidden_size), jnp.float32, 0.5, 1.5)
    params["be1"] = jax.random.uniform(kb1, (1, hidden_size), jnp.float32, -0.5, 0.5)
    params["g2"] = jax.random.uniform(kg2, (1, hidden_size), jnp.float32, 0.5, 1.5)
    params["be2"] = jax.random.uniform(kb2, (1, hidden_size), jnp.float32, -0.5, 0.5)

    # 1) Single-block path (small batch, grid=()).
    x_small = jax.random.normal(kx1, (8, input_size), jnp.float32)
    out_small = generator_forward(x_small, params)
    jax.block_until_ready(out_small)
    ref_small = reference_forward(x_small, params)
    assert out_small.shape == (8, output_size)
    assert bool(jnp.all(jnp.isfinite(out_small)))
    assert bool(jnp.allclose(out_small, ref_small, atol=1e-2)), \
        float(jnp.max(jnp.abs(out_small - ref_small)))

    # 2) Batch-tiled path (3-phase grid, full-batch BN stats in VMEM scratch).
    x_big = jax.random.normal(kx2, (32, input_size), jnp.float32)
    out_big = generator_forward(x_big, params, batch_tile=16)
    jax.block_until_ready(out_big)
    ref_big = reference_forward(x_big, params)
    assert out_big.shape == (32, output_size)
    assert bool(jnp.all(jnp.isfinite(out_big)))
    assert bool(jnp.allclose(out_big, ref_big, atol=1e-2)), \
        float(jnp.max(jnp.abs(out_big - ref_big)))

    print("KERNEL_OK")
</pallas_src>

<mosaic_0001>
module attributes {stable_mosaic.version = 11 : i64} {
  func.func @_single_block_kernel(%arg0: memref<8x8xbf16, #tpu.memory_space<vmem>>, %arg1: memref<8x128xbf16, #tpu.memory_space<vmem>>, %arg2: memref<1x128xf32, #tpu.memory_space<vmem>>, %arg3: memref<1x128xf32, #tpu.memory_space<vmem>>, %arg4: memref<128x128xbf16, #tpu.memory_space<vmem>>, %arg5: memref<1x128xf32, #tpu.memory_space<vmem>>, %arg6: memref<1x128xf32, #tpu.memory_space<vmem>>, %arg7: memref<128x128xbf16, #tpu.memory_space<vmem>>, %arg8: memref<1x128xf32, #tpu.memory_space<vmem>>, %arg9: memref<8x128xf32, #tpu.memory_space<vmem>>) attributes {dimension_semantics = [], scalar_prefetch = 0 : i64, scratch_operands = 0 : i64, tpu.core_type = #tpu.core_type<tc>} {
    %c0 = arith.constant 0 : index
    %c0_0 = arith.constant 0 : index
    %0 = vector.load %arg0[%c0, %c0_0] : memref<8x8xbf16, #tpu.memory_space<vmem>>, vector<8x8xbf16>
    %c0_1 = arith.constant 0 : index
    %c0_2 = arith.constant 0 : index
    %1 = vector.load %arg1[%c0_1, %c0_2] : memref<8x128xbf16, #tpu.memory_space<vmem>>, vector<8x128xbf16>
    %cst = arith.constant dense<0.000000e+00> : vector<8x128xf32>
    %2 = tpu.matmul %0, %1, %cst {dimension_numbers = #tpu.dot_dimension_numbers<[1], [0], [0], [1], [0, 0, 1, 1], [], []>} : vector<8x8xbf16>, vector<8x128xbf16>, vector<8x128xf32> -> vector<8x128xf32>
    %c0_3 = arith.constant 0 : index
    %c0_4 = arith.constant 0 : index
    %3 = vector.load %arg2[%c0_3, %c0_4] : memref<1x128xf32, #tpu.memory_space<vmem>>, vector<1x128xf32>
    %c0_5 = arith.constant 0 : index
    %c0_6 = arith.constant 0 : index
    %4 = vector.load %arg3[%c0_5, %c0_6] : memref<1x128xf32, #tpu.memory_space<vmem>>, vector<1x128xf32>
    %cst_7 = arith.constant dense<0.000000e+00> : vector<128xf32>
    %5 = vector.multi_reduction <add>, %2, %cst_7 [0] : vector<8x128xf32> to vector<128xf32>
    %6 = vector.shape_cast %5 : vector<128xf32> to vector<1x128xf32>
    %7 = arith.mulf %2, %2 : vector<8x128xf32>
    %cst_8 = arith.constant dense<0.000000e+00> : vector<128xf32>
    %8 = vector.multi_reduction <add>, %7, %cst_8 [0] : vector<8x128xf32> to vector<128xf32>
    %9 = vector.shape_cast %8 : vector<128xf32> to vector<1x128xf32>
    %cst_9 = arith.constant 1.250000e-01 : f32
    %10 = vector.broadcast %cst_9 : f32 to vector<1x128xf32>
    %11 = arith.mulf %6, %10 : vector<1x128xf32>
    %cst_10 = arith.constant 1.250000e-01 : f32
    %12 = vector.broadcast %cst_10 : f32 to vector<1x128xf32>
    %13 = arith.mulf %9, %12 : vector<1x128xf32>
    %14 = arith.mulf %11, %11 : vector<1x128xf32>
    %15 = arith.subf %13, %14 : vector<1x128xf32>
    %cst_11 = arith.constant 0.000000e+00 : f32
    %16 = vector.broadcast %cst_11 : f32 to vector<1x128xf32>
    %17 = arith.maximumf %15, %16 : vector<1x128xf32>
    %cst_12 = arith.constant 9.99999974E-6 : f32
    %18 = vector.broadcast %cst_12 : f32 to vector<1x128xf32>
    %19 = arith.addf %17, %18 : vector<1x128xf32>
    %20 = math.rsqrt %19 : vector<1x128xf32>
    %21 = arith.mulf %3, %20 : vector<1x128xf32>
    %22 = arith.mulf %11, %21 : vector<1x128xf32>
    %23 = arith.subf %4, %22 : vector<1x128xf32>
    %24 = vector.broadcast %21 : vector<1x128xf32> to vector<8x128xf32>
    %25 = arith.mulf %2, %24 : vector<8x128xf32>
    %26 = vector.broadcast %23 : vector<1x128xf32> to vector<8x128xf32>
    %27 = arith.addf %25, %26 : vector<8x128xf32>
    %cst_13 = arith.constant 0.000000e+00 : f32
    %28 = vector.broadcast %cst_13 : f32 to vector<8x128xf32>
    %29 = arith.cmpf oge, %27, %28 : vector<8x128xf32>
    %cst_14 = arith.constant 0.00999999977 : f32
    %30 = vector.broadcast %cst_14 : f32 to vector<8x128xf32>
    %31 = arith.mulf %30, %27 : vector<8x128xf32>
    %32 = arith.select %29, %27, %31 : vector<8x128xi1>, vector<8x128xf32>
    %33 = arith.truncf %32 : vector<8x128xf32> to vector<8x128xbf16>
    %c0_15 = arith.constant 0 : index
    %c0_16 = arith.constant 0 : index
    %34 = vector.load %arg4[%c0_15, %c0_16] : memref<128x128xbf16, #tpu.memory_space<vmem>>, vector<128x128xbf16>
    %cst_17 = arith.constant dense<0.000000e+00> : vector<8x128xf32>
    %35 = tpu.matmul %33, %34, %cst_17 {dimension_numbers = #tpu.dot_dimension_numbers<[1], [0], [0], [1], [0, 0, 1, 1], [], []>} : vector<8x128xbf16>, vector<128x128xbf16>, vector<8x128xf32> -> vector<8x128xf32>
    %c0_18 = arith.constant 0 : index
    %c0_19 = arith.constant 0 : index
    %36 = vector.load %arg5[%c0_18, %c0_19] : memref<1x128xf32, #tpu.memory_space<vmem>>, vector<1x128xf32>
    %c0_20 = arith.constant 0 : index
    %c0_21 = arith.constant 0 : index
    %37 = vector.load %arg6[%c0_20, %c0_21] : memref<1x128xf32, #tpu.memory_space<vmem>>, vector<1x128xf32>
    %cst_22 = arith.constant dense<0.000000e+00> : vector<128xf32>
    %38 = vector.multi_reduction <add>, %35, %cst_22 [0] : vector<8x128xf32> to vector<128xf32>
    %39 = vector.shape_cast %38 : vector<128xf32> to vector<1x128xf32>
    %40 = arith.mulf %35, %35 : vector<8x128xf32>
    %cst_23 = arith.constant dense<0.000000e+00> : vector<128xf32>
    %41 = vector.multi_reduction <add>, %40, %cst_23 [0] : vector<8x128xf32> to vector<128xf32>
    %42 = vector.shape_cast %41 : vector<128xf32> to vector<1x128xf32>
    %cst_24 = arith.constant 1.250000e-01 : f32
    %43 = vector.broadcast %cst_24 : f32 to vector<1x128xf32>
    %44 = arith.mulf %39, %43 : vector<1x128xf32>
    %cst_25 = arith.constant 1.250000e-01 : f32
    %45 = vector.broadcast %cst_25 : f32 to vector<1x128xf32>
    %46 = arith.mulf %42, %45 : vector<1x128xf32>
    %47 = arith.mulf %44, %44 : vector<1x128xf32>
    %48 = arith.subf %46, %47 : vector<1x128xf32>
    %cst_26 = arith.constant 0.000000e+00 : f32
    %49 = vector.broadcast %cst_26 : f32 to vector<1x128xf32>
    %50 = arith.maximumf %48, %49 : vector<1x128xf32>
    %cst_27 = arith.constant 9.99999974E-6 : f32
    %51 = vector.broadcast %cst_27 : f32 to vector<1x128xf32>
    %52 = arith.addf %50, %51 : vector<1x128xf32>
    %53 = math.rsqrt %52 : vector<1x128xf32>
    %54 = arith.mulf %36, %53 : vector<1x128xf32>
    %55 = arith.mulf %44, %54 : vector<1x128xf32>
    %56 = arith.subf %37, %55 : vector<1x128xf32>
    %57 = vector.broadcast %54 : vector<1x128xf32> to vector<8x128xf32>
    %58 = arith.mulf %35, %57 : vector<8x128xf32>
    %59 = vector.broadcast %56 : vector<1x128xf32> to vector<8x128xf32>
    %60 = arith.addf %58, %59 : vector<8x128xf32>
    %cst_28 = arith.constant 0.000000e+00 : f32
    %61 = vector.broadcast %cst_28 : f32 to vector<8x128xf32>
    %62 = arith.cmpf oge, %60, %61 : vector<8x128xf32>
    %cst_29 = arith.constant 0.00999999977 : f32
    %63 = vector.broadcast %cst_29 : f32 to vector<8x128xf32>
    %64 = arith.mulf %63, %60 : vector<8x128xf32>
    %65 = arith.select %62, %60, %64 : vector<8x128xi1>, vector<8x128xf32>
    %66 = arith.truncf %65 : vector<8x128xf32> to vector<8x128xbf16>
    %c0_30 = arith.constant 0 : index
    %c0_31 = arith.constant 0 : index
    %67 = vector.load %arg7[%c0_30, %c0_31] : memref<128x128xbf16, #tpu.memory_space<vmem>>, vector<128x128xbf16>
    %cst_32 = arith.constant dense<0.000000e+00> : vector<8x128xf32>
    %68 = tpu.matmul %66, %67, %cst_32 {dimension_numbers = #tpu.dot_dimension_numbers<[1], [0], [0], [1], [0, 0, 1, 1], [], []>} : vector<8x128xbf16>, vector<128x128xbf16>, vector<8x128xf32> -> vector<8x128xf32>
    %c0_33 = arith.constant 0 : index
    %c0_34 = arith.constant 0 : index
    %69 = vector.load %arg8[%c0_33, %c0_34] : memref<1x128xf32, #tpu.memory_space<vmem>>, vector<1x128xf32>
    %70 = vector.broadcast %69 : vector<1x128xf32> to vector<8x128xf32>
    %71 = arith.addf %68, %70 : vector<8x128xf32>
    %72 = math.tanh %71 : vector<8x128xf32>
    %c0_35 = arith.constant 0 : index
    %c0_36 = arith.constant 0 : index
    %73 = vector.load %arg9[%c0_35, %c0_36] : memref<8x128xf32, #tpu.memory_space<vmem>>, vector<8x128xf32>
    tpu.vector_store %arg9[%c0_35, %c0_36], %72 {strides = array<i32>} : memref<8x128xf32, #tpu.memory_space<vmem>>, vector<8x128xf32>,
    return
  }
}

</mosaic_0001>

<bundles_post_ra>
// kernel: tpu_custom_call.1
= control target key start
LH: loop header
LB: loop body
LE: loop exit
PB: predicated region body
PF: predicated region fallthrough
CT: control target
= control target key end

     0   :  { %14 = vsyncpa [#allocation3], 0  ;;  %s848_s0 = inlined_call_operand.hbm [shape: bf16[8,8], index: 0, kind: input, shape index: {}]   ;;  %s849_s1 = inlined_call_operand.hbm [shape: bf16[8,128], index: 1, kind: input, shape index: {}]   ;;  %s850_s2 = inlined_call_operand.vmem [shape: f32[1,128], index: 2, kind: input, shape index: {}]   ;;  %s851_s3 = inlined_call_operand.vmem [shape: f32[1,128], index: 3, kind: input, shape index: {}]   ;;  %s852_s4 = inlined_call_operand.hbm [shape: bf16[128,128], index: 4, kind: input, shape index: {}]   ;;  %s853_s5 = inlined_call_operand.vmem [shape: f32[1,128], index: 5, kind: input, shape index: {}]   ;;  %s854_s6 = inlined_call_operand.vmem [shape: f32[1,128], index: 6, kind: input, shape index: {}]   ;;  %s855_s7 = inlined_call_operand.hbm [shape: bf16[128,128], index: 7, kind: input, shape index: {}]   ;;  %s856_s8 = inlined_call_operand.vmem [shape: f32[1,128], index: 8, kind: input, shape index: {}]   ;;  %s857_s9 = inlined_call_operand.hbm [shape: f32[8,128], index: 9, kind: output, shape index: {}]  }
   0x1   :  { %15 = vsyncpa [#allocation6], 0 }
   0x2   :  { %16 = vsyncpa [#allocation9], 0 }
   0x3   :  { %17 = vsyncpa [#allocation4], 0  ;;  %s688_s30 = smov [#allocation5]   ;;  %s689_s11 = smov [#allocation2]  }
   0x4   :  { %s34_s10 = sshll.u32 %s688_s30, 4  ;;  %s24_s12 = sshll.u32 %s689_s11, 4  ;;  %s35_s10 = int_to_ptr.vmem [resolvable:$true] %s34_s10  ;;  %s25_s12 = int_to_ptr.vmem [resolvable:$true] %s24_s12 }
   0x5   :  { %s570_s15 = scalar_lea.hbm %s849_s1, 64 }
   0x6   :  { %p571_p0 = scmp.ne.s32.totalorder %s849_s1, %s570_s15  ;;  %p574_p1 = scmp.lt.u32.totalorder %s570_s15, %s849_s1 }
   0x8   :  { %p576_p2 = pnand %p574_p1, %p571_p0 }
   0xa   :  { %579 = shalt.err (!%p576_p2)
}
   0xb   :  { %s580_s20 = scalar_lea.vmem %s35_s10, 64  ;;  %p585_p4 = scmp.lt.s32.totalorder %s35_s10, %s35_s10 }
   0xc   :  { %p581_p3 = scmp.ne.s32.totalorder %s35_s10, %s580_s20  ;;  %p586_p5 = scmp.lt.s32.totalorder %s580_s20, %s580_s20 }
   0xe   :  { %p587_p6 = por %p586_p5, %p585_p4 }
  0x10   :  { %p588_p7 = pnand %p587_p6, %p581_p3 }
  0x12   :  { %591 = shalt.err (!%p588_p7)
}
  0x13   :  { %37 = dma.hbm_to_vmem [thread:$0]  %s849_s1, 64, %s35_s10, [#allocation6]  }
  0x14   :  { %s592_s25 = scalar_lea.hbm %s848_s0, 64 }
  0x15   :  { %p593_p8 = scmp.ne.s32.totalorder %s848_s0, %s592_s25  ;;  %p596_p9 = scmp.lt.u32.totalorder %s592_s25, %s848_s0 }
  0x17   :  { %p598_p10 = pnand %p596_p9, %p593_p8 }
  0x19   :  { %601 = shalt.err (!%p598_p10)
}
  0x1a   :  { %s602_s30 = scalar_lea.vmem %s25_s12, 64  ;;  %p607_p12 = scmp.lt.s32.totalorder %s25_s12, %s25_s12 }
  0x1b   :  { %p603_p11 = scmp.ne.s32.totalorder %s25_s12, %s602_s30  ;;  %p608_p13 = scmp.lt.s32.totalorder %s602_s30, %s602_s30 }
  0x1d   :  { %p609_p0 = por %p608_p13, %p607_p12 }
  0x1f   :  { %p610_p1 = pnand %p609_p0, %p603_p11 }
  0x21   :  { %613 = shalt.err (!%p610_p1)
}
  0x22   :  { %27 = dma.hbm_to_vmem [thread:$0]  %s848_s0, 64, %s25_s12, [#allocation3]  }
  0x23   :  { %s690_s11 = smov [#allocation7]   ;;  %s614_s16 = scalar_lea.hbm %s852_s4, 1024 }
  0x24   :  { %s47_s13 = sshll.u32 %s690_s11, 4  ;;  %p615_p2 = scmp.ne.s32.totalorder %s852_s4, %s614_s16  ;;  %s48_s13 = int_to_ptr.vmem [resolvable:$true] %s47_s13 }
  0x25   :  { %p618_p3 = scmp.lt.u32.totalorder %s614_s16, %s852_s4 }
  0x27   :  { %p620_p4 = pnand %p618_p3, %p615_p2 }
  0x29   :  { %623 = shalt.err (!%p620_p4)
}
  0x2a   :  { %s624_s21 = scalar_lea.vmem %s48_s13, 1024  ;;  %p629_p6 = scmp.lt.s32.totalorder %s48_s13, %s48_s13 }
  0x2b   :  { %p625_p5 = scmp.ne.s32.totalorder %s48_s13, %s624_s21  ;;  %p630_p7 = scmp.lt.s32.totalorder %s624_s21, %s624_s21 }
  0x2d   :  { %p631_p8 = por %p630_p7, %p629_p6 }
  0x2f   :  { %p632_p9 = pnand %p631_p8, %p625_p5 }
  0x31   :  { %635 = shalt.err (!%p632_p9)
}
  0x32   :  { %s691_s0 = smov 64   ;;  %s692_s12 = smov 4  }
  0x33   :  { %53 = dma.hbm_to_vmem [thread:$0]  %s852_s4, 1024, %s48_s13, [#allocation6], %s691_s0, %s691_s0, %s692_s12  }
  0x34   :  { %s693_s24 = smov [#allocation8]   ;;  %s636_s28 = scalar_lea.hbm %s855_s7, 1024 }
  0x35   :  { %s63_s25 = sshll.u32 %s693_s24, 4  ;;  %p637_p10 = scmp.ne.s32.totalorder %s855_s7, %s636_s28  ;;  %s64_s25 = int_to_ptr.vmem [resolvable:$true] %s63_s25 }
  0x36   :  { %p640_p11 = scmp.lt.u32.totalorder %s636_s28, %s855_s7 }
  0x38   :  { %p642_p12 = pnand %p640_p11, %p637_p10 }
  0x3a   :  { %645 = shalt.err (!%p642_p12)
}
  0x3b   :  { %s646_s11 = scalar_lea.vmem %s64_s25, 1024  ;;  %p651_p0 = scmp.lt.s32.totalorder %s64_s25, %s64_s25 }
  0x3c   :  { %p647_p13 = scmp.ne.s32.totalorder %s64_s25, %s646_s11  ;;  %p652_p1 = scmp.lt.s32.totalorder %s646_s11, %s646_s11 }
  0x3e   :  { %p653_p2 = por %p652_p1, %p651_p0 }
  0x40   :  { %p654_p3 = pnand %p653_p2, %p647_p13 }
  0x42   :  { %657 = shalt.err (!%p654_p3)
}
  0x43   :  { %69 = dma.hbm_to_vmem [thread:$0]  %s855_s7, 1024, %s64_s25, [#allocation9], %s691_s0, %s691_s0, %s692_s12  }
  0x44   :  { %680 = dma.done.wait [#allocation3], 64  }
  0x45   :  { %681 = vsyncadd [#allocation3], 4294967232 }
  0x46   :  { %682 = dma.done.wait [#allocation6], 1088  }
  0x47   :  { %683 = vsyncadd [#allocation6], 4294966208 }
  0x48   :  { %684 = dma.done.wait [#allocation9], 1024  }
  0x49   :  { %685 = vsyncadd [#allocation9], 4294966272  ;;  %v694_v0 = vmov 0.0   ;;  %vm695_vm0 = vmmov 0   ;;  %vm91_vm1 = vcmask 1043456   ;;  %vm87_vm2 = vcmask 64512  }
  0x4a   :  { %493 = vmatprep.subr.bf16.mxu0 %v694_v0  ;;  %495 = vmatprep.mubr.msk.bf16.mxu0 %vm695_vm0, %v694_v0  ;;  %v86_v1 = vld [vmem:[#allocation5] sm:$0xf]  ;;  %v85_v2 = vld [vmem:[#allocation2] sm:$0xf]  ;;  %v548_v4 = vld [vmem:[#allocation7] sm:$0xff]   ;;  %v161_v35 = vlaneseq }
  0x4b   :  { %499 = vmatprep.subr.bf16.mxu1 %v694_v0  ;;  %515 = vmatprep.mubr.msk.bf16.mxu1 %vm695_vm0, %v694_v0  ;;  %v93_v3 = vsel %vm91_vm1, %v86_v1, 0  ;;  %v549_v5 = vld [vmem:[#allocation7 + $0x8] sm:$0xff]   ;;  %v550_v6 = vld [vmem:[#allocation7 + $0x10] sm:$0xff]   ;;  %v551_v7 = vld [vmem:[#allocation7 + $0x18] sm:$0xff]  }
  0x4c   :  { %494 = vmatpush3.bf16.msra.mxu0 %v93_v3  ;;  %500 = vmatpush3.bf16.msra.mxu1 %v548_v4  ;;  %v552_v8 = vld [vmem:[#allocation7 + $0x20] sm:$0xff]   ;;  %v553_v9 = vld [vmem:[#allocation7 + $0x28] sm:$0xff]   ;;  %v554_v10 = vld [vmem:[#allocation7 + $0x30] sm:$0xff]   ;;  %v162_v36 = vshrl.u32 %v161_v35, 7 }
  0x4d   :  { %519 = vmatprep.subr.bf16.mxu0 %v694_v0  ;;  %501 = vmatprep.subr.bf16.mxu1 %v694_v0  ;;  %v555_v11 = vld [vmem:[#allocation7 + $0x38] sm:$0xff]   ;;  %v556_v51 = vld [vmem:[#allocation8] sm:$0xff]   ;;  %v557_v52 = vld [vmem:[#allocation8 + $0x8] sm:$0xff]  }
  0x4e   :  { %v135_v37 = vld [vmem:[%s850_s2] sm:$0x1]  ;;  %v811_v38 = vsub.s32 0, %v162_v36  ;;  %v558_v53 = vld [vmem:[#allocation8 + $0x10] sm:$0xff]   ;;  %v560_v55 = vld [vmem:[#allocation8 + $0x20] sm:$0xff]  }
  0x4f   :  { %496 = vmatmul.mubr.msk.bf16.vlgmr.msra.gmra.mrb[0].mxu0 %vm87_vm2, %v85_v2  ;;  %v136_v41 = vld [vmem:[%s851_s3] sm:$0x1]  ;;  %v561_v56 = vld [vmem:[#allocation8 + $0x28] sm:$0xff]   ;;  %v562_v57 = vld [vmem:[#allocation8 + $0x30] sm:$0xff]  }
  0x50   :  { %535 = vmatprep.mubr.msk.bf16.mxu0 %vm695_vm0, %v694_v0  ;;  %502 = vmatpush3.bf16.msra.mxu1 %v549_v5  ;;  %v559_v54 = vld [vmem:[#allocation8 + $0x18] sm:$0xff]  }
  0x51   :  { %503 = vmatprep.subr.bf16.mxu1 %v694_v0  ;;  %520 = vmatpush3.bf16.msra.mxu0 %v556_v51  ;;  %v563_v58 = vld [vmem:[#allocation8 + $0x38] sm:$0xff]  }
  0x52   :  { %521 = vmatprep.subr.bf16.mxu0 %v694_v0 }
  0x54   :  { %504 = vmatpush3.bf16.msra.mxu1 %v550_v6 }
  0x55   :  { %505 = vmatprep.subr.bf16.mxu1 %v694_v0  ;;  %522 = vmatpush3.bf16.msra.mxu0 %v557_v52 }
  0x56   :  { %523 = vmatprep.subr.bf16.mxu0 %v694_v0 }
  0x58   :  { %506 = vmatpush3.bf16.msra.mxu1 %v551_v7 }
  0x59   :  { %507 = vmatprep.subr.bf16.mxu1 %v694_v0  ;;  %524 = vmatpush3.bf16.msra.mxu0 %v558_v53 }
  0x5a   :  { %525 = vmatprep.subr.bf16.mxu0 %v694_v0 }
  0x5c   :  { %508 = vmatpush3.bf16.msra.mxu1 %v552_v8 }
  0x5d   :  { %509 = vmatprep.subr.bf16.mxu1 %v694_v0  ;;  %526 = vmatpush3.bf16.msra.mxu0 %v559_v54 }
  0x5e   :  { %527 = vmatprep.subr.bf16.mxu0 %v694_v0 }
  0x60   :  { %510 = vmatpush3.bf16.msra.mxu1 %v553_v9 }
  0x61   :  { %511 = vmatprep.subr.bf16.mxu1 %v694_v0  ;;  %528 = vmatpush3.bf16.msra.mxu0 %v560_v55 }
  0x62   :  { %529 = vmatprep.subr.bf16.mxu0 %v694_v0 }
  0x64   :  { %512 = vmatpush3.bf16.msra.mxu1 %v554_v10 }
  0x65   :  { %513 = vmatprep.subr.bf16.mxu1 %v694_v0  ;;  %530 = vmatpush3.bf16.msra.mxu0 %v561_v56 }
  0x66   :  { %531 = vmatprep.subr.bf16.mxu0 %v694_v0 }
  0x68   :  { %514 = vmatpush3.bf16.msra.mxu1 %v555_v11 }
  0x69   :  { %532 = vmatpush3.bf16.msra.mxu0 %v562_v57 }
  0x6a   :  { %533 = vmatprep.subr.bf16.mxu0 %v694_v0 }
  0x6d   :  { %534 = vmatpush3.bf16.msra.mxu0 %v563_v58 }
 0x122   :  { %v129_v12 = vpop.f32.mrb[0].mxu0 }
 0x123   :  { %v137_v13 = vrot.slane %v129_v12, 4  ;;  %v143_v14 = vmul.f32 %v129_v12, %v129_v12  ;;  %v497_v15 = vpop.f32.mrb[1].mxu0 }
 0x124   :  { %v132_v16 = vpop.f32.mrb[2].mxu0 }
 0x125   :  { %v138_v17 = vadd.f32 %v137_v13, %v129_v12  ;;  %v144_v18 = vrot.slane %v143_v14, 4  ;;  %v498_v19 = vpop.f32.mrb[3].mxu0 }
 0x127   :  { %v139_v20 = vrot.slane %v138_v17, 2  ;;  %v145_v21 = vadd.f32 %v144_v18, %v143_v14  ;;  %v282_v18 = vld [vmem:[%s853_s5] sm:$0x1] }
 0x129   :  { %v140_v22 = vadd.f32 %v139_v20, %v138_v17  ;;  %v146_v23 = vrot.slane %v145_v21, 2 }
 0x12b   :  { %v141_v24 = vrot.slane %v140_v22, 1  ;;  %v147_v25 = vadd.f32 %v146_v23, %v145_v21  ;;  %v283_v21 = vld [vmem:[%s854_s6] sm:$0x1]  ;;  %s696_s6 = smov [#allocation10]  }
 0x12c   :  { %s444_s20 = sshll.u32 %s696_s6, 4  ;;  %s445_s20 = int_to_ptr.vmem [resolvable:$true] %s444_s20 }
 0x12d   :  { %v142_v26 = vadd.f32 %v141_v24, %v140_v22  ;;  %v148_v27 = vrot.slane %v147_v25, 1  ;;  %s658_s21 = scalar_lea.vmem %s445_s20, 128  ;;  %p663_p5 = scmp.lt.s32.totalorder %s445_s20, %s445_s20 }
 0x12e   :  { %p659_p4 = scmp.ne.s32.totalorder %s445_s20, %s658_s21  ;;  %p664_p6 = scmp.lt.s32.totalorder %s658_s21, %s658_s21 }
 0x12f   :  { %v149_v28 = vadd.f32 %v148_v27, %v147_v25  ;;  %v150_v29 = vmul.f32 0.125, %v142_v26 }
 0x130   :  { %p665_p7 = por %p664_p6, %p663_p5 }
 0x131   :  { %v151_v30 = vmul.f32 0.125, %v149_v28  ;;  %v152_v31 = vmul.f32 %v150_v29, %v150_v29 }
 0x132   :  { %p666_p8 = pnand %p665_p7, %p659_p4 }
 0x133   :  { %v153_v32 = vsub.f32 %v151_v30, %v152_v31  ;;  %v464_v31 = vld [vmem:[%s856_s8] ss:$0 sm:$0xff] }
 0x135   :  { %v154_v33 = vmax.f32 %v153_v32, 0.0 }
 0x137   :  { %v155_v34 = vadd.f32 1e-05, %v154_v33 }
 0x139   :  { %564 = vrsqrt.f32 %v155_v34 }
 0x143   :  { %v565_v39 = vpop.eup %564 }
 0x144   :  { %v157_v40 = vmul.f32 %v565_v39, %v135_v37 }
 0x146   :  { %v158_v42 = vmul.f32 %v157_v40, %v150_v29  ;;  %v164_v43 = vrot.slane %v157_v40, %v811_v38 }
 0x148   :  { %v159_v44 = vsub.f32 %v136_v41, %v158_v42  ;;  %v166_v45 = vmul.f32 %v164_v43, %v129_v12 }
 0x14a   :  { %v171_v46 = vrot.slane %v159_v44, %v811_v38 }
 0x14c   :  { %v173_v47 = vadd.f32 %v171_v46, %v166_v45 }
 0x14e   :  { %vm174_vm3 = vcmp.ge.f32.partialorder %v173_v47, 0.0  ;;  %v175_v48 = vmul.f32 0.01, %v173_v47 }
 0x150   :  { %v176_v49 = vsel %vm174_vm3, %v173_v47, %v175_v48 }
 0x151   :  { %v177_v50 = vpack.c.bf16 %v176_v49, %v176_v49 }
 0x153   :  { %516 = vmatmul.mubr.bf16.vlgmr.msra.gmra.mrb[0].mxu1 %v177_v50 }
 0x226   :  { %v276_v59 = vpop.f32.mrb[0].mxu1 }
 0x227   :  { %v284_v60 = vrot.slane %v276_v59, 4  ;;  %v290_v61 = vmul.f32 %v276_v59, %v276_v59  ;;  %v517_v62 = vpop.f32.mrb[1].mxu1 }
 0x228   :  { %v279_v63 = vpop.f32.mrb[2].mxu1 }
 0x229   :  { %v285_v1 = vadd.f32 %v284_v60, %v276_v59  ;;  %v291_v2 = vrot.slane %v290_v61, 4  ;;  %v518_v3 = vpop.f32.mrb[3].mxu1 }
 0x22b   :  { %v286_v4 = vrot.slane %v285_v1, 2  ;;  %v292_v5 = vadd.f32 %v291_v2, %v290_v61 }
 0x22d   :  { %v287_v6 = vadd.f32 %v286_v4, %v285_v1  ;;  %v293_v7 = vrot.slane %v292_v5, 2 }
 0x22f   :  { %v288_v8 = vrot.slane %v287_v6, 1  ;;  %v294_v9 = vadd.f32 %v293_v7, %v292_v5 }
 0x231   :  { %v289_v10 = vadd.f32 %v288_v8, %v287_v6  ;;  %v295_v11 = vrot.slane %v294_v9, 1 }
 0x233   :  { %v296_v12 = vadd.f32 %v295_v11, %v294_v9  ;;  %v297_v13 = vmul.f32 0.125, %v289_v10 }
 0x235   :  { %v298_v0 = vmul.f32 0.125, %v296_v12  ;;  %v299_v14 = vmul.f32 %v297_v13, %v297_v13 }
 0x237   :  { %v300_v15 = vsub.f32 %v298_v0, %v299_v14 }
 0x239   :  { %v301_v16 = vmax.f32 %v300_v15, 0.0 }
 0x23b   :  { %v302_v17 = vadd.f32 1e-05, %v301_v16 }
 0x23d   :  { %566 = vrsqrt.f32 %v302_v17 }
 0x247   :  { %v567_v19 = vpop.eup %566 }
 0x248   :  { %v304_v20 = vmul.f32 %v567_v19, %v282_v18 }
 0x24a   :  { %v305_v22 = vmul.f32 %v304_v20, %v297_v13  ;;  %v311_v23 = vrot.slane %v304_v20, %v811_v38 }
 0x24c   :  { %v306_v24 = vsub.f32 %v283_v21, %v305_v22  ;;  %v313_v25 = vmul.f32 %v311_v23, %v276_v59 }
 0x24e   :  { %v318_v26 = vrot.slane %v306_v24, %v811_v38 }
 0x250   :  { %v320_v27 = vadd.f32 %v318_v26, %v313_v25 }
 0x252   :  { %vm321_vm4 = vcmp.ge.f32.partialorder %v320_v27, 0.0  ;;  %v322_v28 = vmul.f32 0.01, %v320_v27 }
 0x254   :  { %v323_v29 = vsel %vm321_vm4, %v320_v27, %v322_v28 }
 0x255   :  { %v324_v30 = vpack.c.bf16 %v323_v29, %v323_v29 }
 0x257   :  { %536 = vmatmul.mubr.bf16.vlgmr.msra.gmra.mrb[4].mxu0 %v324_v30 }
 0x32a   :  { %v430_v32 = vpop.f32.mrb[4].mxu0 }
 0x32b   :  { %v431_v33 = vadd.f32 %v464_v31, %v430_v32  ;;  %v537_v34 = vpop.f32.mrb[5].mxu0 }
 0x32c   :  { %v433_v35 = vpop.f32.mrb[6].mxu0 }
 0x32d   :  { %568 = vtanh.f32 %v431_v33  ;;  %v538_v36 = vpop.f32.mrb[7].mxu0 }
 0x337   :  { %v569_v37 = vpop.eup %568 }
 0x338   :  { %437 = vst [vmem:[#allocation10] sm:$0xff] %v569_v37 }
 0x339   :  { %669 = shalt.err (!%p666_p8)
}
 0x33a   :  { %s670_s12 = scalar_lea.hbm %s857_s9, 128 }
 0x33b   :  { %p671_p9 = scmp.ne.s32.totalorder %s857_s9, %s670_s12  ;;  %p674_p10 = scmp.lt.u32.totalorder %s670_s12, %s857_s9 }
 0x33d   :  { %p676_p11 = pnand %p674_p10, %p671_p9 }
 0x33f   :  { %679 = shalt.err (!%p676_p11)
}
 0x340   :  { %447 = dma.vmem_to_hbm [thread:$0]  %s445_s20, 128, %s857_s9, [#allocation4]  }
 0x341   :  { %686 = dma.done.wait [#allocation4], 128  }
 0x342   :  { %687 = vsyncadd [#allocation4], 4294967168 }
 0x343   :  { %451 = vsyncpa [#allocation3], 1 }
 0x344   :  { %452 = vsyncpa [#allocation6], 1 }
 0x345   :  { %453 = vsyncpa [#allocation9], 1 }
 0x346   :  { %454 = vsyncpa [#allocation4], 1 }

</bundles_post_ra>
